<compile_context>
chip_gen: v7x
topology: tpu7x:2x2x1
jax: 0.10.0
libtpu: 0.0.40
codegen_flags: <defaults>
</compile_context>

<pallas_src>
import functools

import jax
import jax.numpy as jnp
import numpy as np
from jax.experimental import pallas as pl
from jax.experimental.pallas import tpu as pltpu

LOG_SIG_MAX = 2.0
LOG_SIG_MIN = -20.0


def _round_up(x: int, m: int) -> int:
    return ((x + m - 1) // m) * m


def _gaussian_policy_kernel(state_ref,
                            w1_ref, b1_ref,
                            w2_ref, b2_ref,
                            wh_ref, bh_ref,
                            lo_ref, hi_ref,
                            out_ref,
                            *, compute_dtype):
    """One batch tile: trunk (2x linear+relu) + fused mean||log_std head."""

    def mm(a, w_ref):
        w = w_ref[...]
        if compute_dtype is not None:
            a = a.astype(compute_dtype)
            w = w.astype(compute_dtype)
        return jnp.dot(a, w, preferred_element_type=jnp.float32)

    x = state_ref[...]

    # linear1 + relu
    h1 = jnp.maximum(mm(x, w1_ref) + b1_ref[...], 0.0)
    # linear2 + relu
    h2 = jnp.maximum(mm(h1, w2_ref) + b2_ref[...], 0.0)

    # fused heads: columns [0, A) = mean, [A, 2A) = log_std
    head = mm(h2, wh_ref) + bh_ref[...]

    # Per-lane clamp: lo/hi are (-inf, +inf) on the mean lanes and
    # (LOG_SIG_MIN, LOG_SIG_MAX) on the log_std lanes -> 2 VPU ops, no
    # iota/select and no sub-lane slicing inside the kernel.
    head = jnp.minimum(jnp.maximum(head, lo_ref[...]), hi_ref[...])

    out_ref[...] = head.astype(out_ref.dtype)


def gaussian_policy_forward(state, params, *, block_batch=512, compute_dtype=None):
    """Pallas-backed forward pass. Returns (mean, log_std).

    state:  (B, state_dim) f32
    params: dict with w1/b1, w2/b2 and either fused wh/bh/head_lo/head_hi
            (from init_params) or separate wm/bm, ws/bs.
    compute_dtype: e.g. jnp.bfloat16 for bf16 MXU inputs on v6e/v7x
                   (accumulation stays f32). None => pure f32.
    """
    B, state_dim = state.shape
    hidden_dim = params["w1"].shape[1]

    if "wh" in params:
        w_head = params["wh"]
        b_head = params["bh"]
        lo = params["head_lo"]
        hi = params["head_hi"]
        action_dim = w_head.shape[1] // 2
    else:
        action_dim = params["wm"].shape[1]
        w_head = jnp.concatenate([params["wm"], params["ws"]], axis=1)   # (H, 2A)
        b_head = jnp.concatenate([params["bm"], params["bs"]], axis=1)   # (1, 2A)
        lo, hi = _make_head_bounds(action_dim)
    head_dim = 2 * action_dim

    # Batch tile: multiple of 8 sublanes, capped by block_batch; pad B to it.
    tm = min(_round_up(block_batch, 8), _round_up(B, 8))
    b_pad = _round_up(B, tm)
    if b_pad != B:
        state = jnp.pad(state, ((0, b_pad - B), (0, 0)))
    grid = (b_pad // tm,)

    kernel = functools.partial(_gaussian_policy_kernel,
                               compute_dtype=compute_dtype)

    # Weights/biases/bounds: constant index_map => DMA'd once, VMEM-resident.
    const2d = lambda i: (0, 0)
    batched = lambda i: (i, 0)

    in_specs = [
        pl.BlockSpec((tm, state_dim), batched),                # state tile
        pl.BlockSpec(params["w1"].shape, const2d),             # w1
        pl.BlockSpec(params["b1"].shape, const2d),             # b1
        pl.BlockSpec(params["w2"].shape, const2d),             # w2
        pl.BlockSpec(params["b2"].shape, const2d),             # b2
        pl.BlockSpec(w_head.shape, const2d),                   # fused head W
        pl.BlockSpec(b_head.shape, const2d),                   # fused head b
        pl.BlockSpec(lo.shape, const2d),                       # per-lane lower bound
        pl.BlockSpec(hi.shape, const2d),                       # per-lane upper bound
    ]
    out_spec = pl.BlockSpec((tm, head_dim), batched)

    # Advisory cost estimate for the XLA scheduler.
    flops = 2 * b_pad * (state_dim * hidden_dim
                         + hidden_dim * hidden_dim
                         + hidden_dim * head_dim)
    bytes_accessed = 4 * (b_pad * state_dim
                          + state_dim * hidden_dim + hidden_dim
                          + hidden_dim * hidden_dim + hidden_dim
                          + hidden_dim * head_dim + 3 * head_dim
                          + b_pad * head_dim)
    cost = pl.CostEstimate(flops=flops, transcendentals=0,
                           bytes_accessed=bytes_accessed)

    fused_out = pl.pallas_call(
        kernel,
        out_shape=jax.ShapeDtypeStruct((b_pad, head_dim), jnp.float32),
        grid_spec=pltpu.PrefetchScalarGridSpec(
            num_scalar_prefetch=0,
            grid=grid,
            in_specs=in_specs,
            out_specs=out_spec,
        ),
        compiler_params=pltpu.CompilerParams(
            dimension_semantics=("parallel",),   # batch tiles shard across TCs on v7x
        ),
        cost_estimate=cost,
    )(state, params["w1"], params["b1"], params["w2"], params["b2"],
      w_head, b_head, lo, hi)

    mean = fused_out[:B, :action_dim]
    log_std = fused_out[:B, action_dim:]
    return mean, log_std


def _make_head_bounds(action_dim):
    """Per-lane clamp bounds for the fused (mean || log_std) head."""
    lo = jnp.concatenate([jnp.full((1, action_dim), -jnp.inf, jnp.float32),
                          jnp.full((1, action_dim), LOG_SIG_MIN, jnp.float32)], axis=1)
    hi = jnp.concatenate([jnp.full((1, action_dim), jnp.inf, jnp.float32),
                          jnp.full((1, action_dim), LOG_SIG_MAX, jnp.float32)], axis=1)
    return lo, hi


def xavier_uniform(key, fan_in, fan_out):
    """PyTorch nn.init.xavier_uniform_ (gain=1), returned as (in, out)."""
    bound = float(np.sqrt(6.0 / (fan_in + fan_out)))
    # PyTorch weight is (out, in); we store its transpose (in, out).
    w = jax.random.uniform(key, (fan_out, fan_in), jnp.float32, -bound, bound)
    return jnp.transpose(w)


def init_params(key, state_dim, action_dim, hidden_dim):
    k1, k2, k3, k4 = jax.random.split(key, 4)
    wm = xavier_uniform(k3, hidden_dim, action_dim)
    ws = xavier_uniform(k4, hidden_dim, action_dim)
    bm = jnp.zeros((1, action_dim), jnp.float32)
    bs = jnp.zeros((1, action_dim), jnp.float32)
    lo, hi = _make_head_bounds(action_dim)
    return {
        "w1": xavier_uniform(k1, state_dim, hidden_dim),
        "b1": jnp.zeros((1, hidden_dim), jnp.float32),
        "w2": xavier_uniform(k2, hidden_dim, hidden_dim),
        "b2": jnp.zeros((1, hidden_dim), jnp.float32),
        # Separate heads kept for the reference implementation.
        "wm": wm, "bm": bm, "ws": ws, "bs": bs,
        # Pre-fused head + clamp bounds used by the Pallas kernel.
        "wh": jnp.concatenate([wm, ws], axis=1),
        "bh": jnp.concatenate([bm, bs], axis=1),
        "head_lo": lo,
        "head_hi": hi,
    }


def reference_forward(state, params):
    h1 = jnp.maximum(state @ params["w1"] + params["b1"], 0.0)
    h2 = jnp.maximum(h1 @ params["w2"] + params["b2"], 0.0)
    mean = h2 @ params["wm"] + params["bm"]
    log_std = jnp.clip(h2 @ params["ws"] + params["bs"], LOG_SIG_MIN, LOG_SIG_MAX)
    return mean, log_std


if __name__ == "__main__":
    key = jax.random.PRNGKey(0)
    k_params, k_state = jax.random.split(key)

    batch = 2
    state_dim = 16
    action_dim = 8
    hidden_dim = 32

    params = init_params(k_params, state_dim, action_dim, hidden_dim)
    state = jax.random.normal(k_state, (batch, state_dim), jnp.float32)

    mean, log_std = gaussian_policy_forward(state, params)
    jax.block_until_ready((mean, log_std))

    ref_mean, ref_log_std = reference_forward(state, params)
    np.testing.assert_allclose(np.asarray(mean), np.asarray(ref_mean),
                               rtol=1e-5, atol=1e-5)
    np.testing.assert_allclose(np.asarray(log_std), np.asarray(ref_log_std),
                               rtol=1e-5, atol=1e-5)

    # Also exercise the batch-tiled path with a non-tile-aligned larger batch.
    big_state = jax.random.normal(jax.random.PRNGKey(1), (37, state_dim), jnp.float32)
    bm, bl = gaussian_policy_forward(big_state, params, block_batch=16)
    jax.block_until_ready((bm, bl))
    rbm, rbl = reference_forward(big_state, params)
    np.testing.assert_allclose(np.asarray(bm), np.asarray(rbm), rtol=1e-5, atol=1e-5)
    np.testing.assert_allclose(np.asarray(bl), np.asarray(rbl), rtol=1e-5, atol=1e-5)

    print("KERNEL_OK")
</pallas_src>

<mosaic_0001>
module attributes {stable_mosaic.version = 11 : i64} {
  func.func @_gaussian_policy_kernel(%arg0: i32, %arg1: memref<8x16xf32, #tpu.memory_space<vmem>>, %arg2: memref<16x32xf32, #tpu.memory_space<vmem>>, %arg3: memref<1x32xf32, #tpu.memory_space<vmem>>, %arg4: memref<32x32xf32, #tpu.memory_space<vmem>>, %arg5: memref<1x32xf32, #tpu.memory_space<vmem>>, %arg6: memref<32x16xf32, #tpu.memory_space<vmem>>, %arg7: memref<1x16xf32, #tpu.memory_space<vmem>>, %arg8: memref<1x16xf32, #tpu.memory_space<vmem>>, %arg9: memref<1x16xf32, #tpu.memory_space<vmem>>, %arg10: memref<8x16xf32, #tpu.memory_space<vmem>>) attributes {dimension_semantics = [#tpu.dimension_semantics<parallel>], iteration_bounds = array<i64: 1>, scalar_prefetch = 0 : i64, scratch_operands = 0 : i64, tpu.core_type = #tpu.core_type<tc>, window_params = [{transform_indices = @transform_0, window_bounds = array<i64: 8, 16>}, {pipeline_mode = #tpu.pipeline_mode<synchronous>, transform_indices = @transform_1, window_bounds = array<i64: 16, 32>}, {pipeline_mode = #tpu.pipeline_mode<synchronous>, transform_indices = @transform_2, window_bounds = array<i64: 1, 32>}, {pipeline_mode = #tpu.pipeline_mode<synchronous>, transform_indices = @transform_3, window_bounds = array<i64: 32, 32>}, {pipeline_mode = #tpu.pipeline_mode<synchronous>, transform_indices = @transform_4, window_bounds = array<i64: 1, 32>}, {pipeline_mode = #tpu.pipeline_mode<synchronous>, transform_indices = @transform_5, window_bounds = array<i64: 32, 16>}, {pipeline_mode = #tpu.pipeline_mode<synchronous>, transform_indices = @transform_6, window_bounds = array<i64: 1, 16>}, {pipeline_mode = #tpu.pipeline_mode<synchronous>, transform_indices = @transform_7, window_bounds = array<i64: 1, 16>}, {pipeline_mode = #tpu.pipeline_mode<synchronous>, transform_indices = @transform_8, window_bounds = array<i64: 1, 16>}, {transform_indices = @transform_9, window_bounds = array<i64: 8, 16>}]} {
    %c0 = arith.constant 0 : index
    %c0_0 = arith.constant 0 : index
    %0 = vector.load %arg1[%c0, %c0_0] : memref<8x16xf32, #tpu.memory_space<vmem>>, vector<8x16xf32>
    %c0_1 = arith.constant 0 : index
    %c0_2 = arith.constant 0 : index
    %1 = vector.load %arg2[%c0_1, %c0_2] : memref<16x32xf32, #tpu.memory_space<vmem>>, vector<16x32xf32>
    %cst = arith.constant dense<0.000000e+00> : vector<8x32xf32>
    %2 = tpu.matmul %0, %1, %cst {dimension_numbers = #tpu.dot_dimension_numbers<[1], [0], [0], [1], [0, 0, 1, 1], [], []>} : vector<8x16xf32>, vector<16x32xf32>, vector<8x32xf32> -> vector<8x32xf32>
    %c0_3 = arith.constant 0 : index
    %c0_4 = arith.constant 0 : index
    %3 = vector.load %arg3[%c0_3, %c0_4] : memref<1x32xf32, #tpu.memory_space<vmem>>, vector<1x32xf32>
    %4 = vector.broadcast %3 : vector<1x32xf32> to vector<8x32xf32>
    %5 = arith.addf %2, %4 : vector<8x32xf32>
    %cst_5 = arith.constant 0.000000e+00 : f32
    %6 = vector.broadcast %cst_5 : f32 to vector<8x32xf32>
    %7 = arith.maximumf %5, %6 : vector<8x32xf32>
    %c0_6 = arith.constant 0 : index
    %c0_7 = arith.constant 0 : index
    %8 = vector.load %arg4[%c0_6, %c0_7] : memref<32x32xf32, #tpu.memory_space<vmem>>, vector<32x32xf32>
    %cst_8 = arith.constant dense<0.000000e+00> : vector<8x32xf32>
    %9 = tpu.matmul %7, %8, %cst_8 {dimension_numbers = #tpu.dot_dimension_numbers<[1], [0], [0], [1], [0, 0, 1, 1], [], []>} : vector<8x32xf32>, vector<32x32xf32>, vector<8x32xf32> -> vector<8x32xf32>
    %c0_9 = arith.constant 0 : index
    %c0_10 = arith.constant 0 : index
    %10 = vector.load %arg5[%c0_9, %c0_10] : memref<1x32xf32, #tpu.memory_space<vmem>>, vector<1x32xf32>
    %11 = vector.broadcast %10 : vector<1x32xf32> to vector<8x32xf32>
    %12 = arith.addf %9, %11 : vector<8x32xf32>
    %cst_11 = arith.constant 0.000000e+00 : f32
    %13 = vector.broadcast %cst_11 : f32 to vector<8x32xf32>
    %14 = arith.maximumf %12, %13 : vector<8x32xf32>
    %c0_12 = arith.constant 0 : index
    %c0_13 = arith.constant 0 : index
    %15 = vector.load %arg6[%c0_12, %c0_13] : memref<32x16xf32, #tpu.memory_space<vmem>>, vector<32x16xf32>
    %cst_14 = arith.constant dense<0.000000e+00> : vector<8x16xf32>
    %16 = tpu.matmul %14, %15, %cst_14 {dimension_numbers = #tpu.dot_dimension_numbers<[1], [0], [0], [1], [0, 0, 1, 1], [], []>} : vector<8x32xf32>, vector<32x16xf32>, vector<8x16xf32> -> vector<8x16xf32>
    %c0_15 = arith.constant 0 : index
    %c0_16 = arith.constant 0 : index
    %17 = vector.load %arg7[%c0_15, %c0_16] : memref<1x16xf32, #tpu.memory_space<vmem>>, vector<1x16xf32>
    %18 = vector.broadcast %17 : vector<1x16xf32> to vector<8x16xf32>
    %19 = arith.addf %16, %18 : vector<8x16xf32>
    %c0_17 = arith.constant 0 : index
    %c0_18 = arith.constant 0 : index
    %20 = vector.load %arg8[%c0_17, %c0_18] : memref<1x16xf32, #tpu.memory_space<vmem>>, vector<1x16xf32>
    %21 = vector.broadcast %20 : vector<1x16xf32> to vector<8x16xf32>
    %22 = arith.maximumf %19, %21 : vector<8x16xf32>
    %c0_19 = arith.constant 0 : index
    %c0_20 = arith.constant 0 : index
    %23 = vector.load %arg9[%c0_19, %c0_20] : memref<1x16xf32, #tpu.memory_space<vmem>>, vector<1x16xf32>
    %24 = vector.broadcast %23 : vector<1x16xf32> to vector<8x16xf32>
    %25 = arith.minimumf %22, %24 : vector<8x16xf32>
    %c0_21 = arith.constant 0 : index
    %c0_22 = arith.constant 0 : index
    %26 = vector.load %arg10[%c0_21, %c0_22] : memref<8x16xf32, #tpu.memory_space<vmem>>, vector<8x16xf32>
    tpu.vector_store %arg10[%c0_21, %c0_22], %25 {strides = array<i32>} : memref<8x16xf32, #tpu.memory_space<vmem>>, vector<8x16xf32>,
    return
  }
  func.func @transform_0(%arg0: i32) -> (i32, i32) {
    %c0_i32 = arith.constant 0 : i32
    %c0_i32_0 = arith.constant 0 : i32
    return %arg0, %c0_i32 : i32, i32
  }
  func.func @transform_1(%arg0: i32) -> (i32, i32) {
    %c0_i32 = arith.constant 0 : i32
    %c0_i32_0 = arith.constant 0 : i32
    %c0_i32_1 = arith.constant 0 : i32
    return %c0_i32, %c0_i32_0 : i32, i32
  }
  func.func @transform_2(%arg0: i32) -> (i32, i32) {
    %c0_i32 = arith.constant 0 : i32
    %c0_i32_0 = arith.constant 0 : i32
    %c0_i32_1 = arith.constant 0 : i32
    return %c0_i32, %c0_i32_0 : i32, i32
  }
  func.func @transform_3(%arg0: i32) -> (i32, i32) {
    %c0_i32 = arith.constant 0 : i32
    %c0_i32_0 = arith.constant 0 : i32
    %c0_i32_1 = arith.constant 0 : i32
    return %c0_i32, %c0_i32_0 : i32, i32
  }
  func.func @transform_4(%arg0: i32) -> (i32, i32) {
    %c0_i32 = arith.constant 0 : i32
    %c0_i32_0 = arith.constant 0 : i32
    %c0_i32_1 = arith.constant 0 : i32
    return %c0_i32, %c0_i32_0 : i32, i32
  }
  func.func @transform_5(%arg0: i32) -> (i32, i32) {
    %c0_i32 = arith.constant 0 : i32
    %c0_i32_0 = arith.constant 0 : i32
    %c0_i32_1 = arith.constant 0 : i32
    return %c0_i32, %c0_i32_0 : i32, i32
  }
  func.func @transform_6(%arg0: i32) -> (i32, i32) {
    %c0_i32 = arith.constant 0 : i32
    %c0_i32_0 = arith.constant 0 : i32
    %c0_i32_1 = arith.constant 0 : i32
    return %c0_i32, %c0_i32_0 : i32, i32
  }
  func.func @transform_7(%arg0: i32) -> (i32, i32) {
    %c0_i32 = arith.constant 0 : i32
    %c0_i32_0 = arith.constant 0 : i32
    %c0_i32_1 = arith.constant 0 : i32
    return %c0_i32, %c0_i32_0 : i32, i32
  }
  func.func @transform_8(%arg0: i32) -> (i32, i32) {
    %c0_i32 = arith.constant 0 : i32
    %c0_i32_0 = arith.constant 0 : i32
    %c0_i32_1 = arith.constant 0 : i32
    return %c0_i32, %c0_i32_0 : i32, i32
  }
  func.func @transform_9(%arg0: i32) -> (i32, i32) {
    %c0_i32 = arith.constant 0 : i32
    %c0_i32_0 = arith.constant 0 : i32
    return %arg0, %c0_i32 : i32, i32
  }
}

</mosaic_0001>

<bundles_post_ra>
// kernel: tpu_custom_call.1
= control target key start
LH: loop header
LB: loop body
LE: loop exit
PB: predicated region body
PF: predicated region fallthrough
CT: control target
= control target key end

     0   :  { %14 = vsyncpa [#allocation3], 0  ;;  %s579_s0 = inlined_call_operand.hbm [shape: f32[8,16], index: 0, kind: input, shape index: {}]   ;;  %s580_s1 = inlined_call_operand.vmem [shape: f32[16,32], index: 1, kind: input, shape index: {}]   ;;  %s581_s2 = inlined_call_operand.vmem [shape: f32[1,32], index: 2, kind: input, shape index: {}]   ;;  %s582_s3 = inlined_call_operand.vmem [shape: f32[32,32], index: 3, kind: input, shape index: {}]   ;;  %s583_s4 = inlined_call_operand.vmem [shape: f32[1,32], index: 4, kind: input, shape index: {}]   ;;  %s584_s5 = inlined_call_operand.vmem [shape: f32[32,16], index: 5, kind: input, shape index: {}]   ;;  %s585_s6 = inlined_call_operand.vmem [shape: f32[1,16], index: 6, kind: input, shape index: {}]   ;;  %s586_s7 = inlined_call_operand.vmem [shape: f32[1,16], index: 7, kind: input, shape index: {}]   ;;  %s587_s8 = inlined_call_operand.vmem [shape: f32[1,16], index: 8, kind: input, shape index: {}]   ;;  %s588_s9 = inlined_call_operand.hbm [shape: f32[8,16], index: 9, kind: output, shape index: {}]  }
   0x1   :  { %15 = vsyncpa [#allocation4], 0  ;;  %s450_s30 = smov [#allocation2]   ;;  %s402_s13 = scalar_lea.hbm %s579_s0, 128 }
   0x2   :  { %s22_s10 = sshll.u32 %s450_s30, 4  ;;  %p403_p0 = scmp.ne.s32.totalorder %s579_s0, %s402_s13  ;;  %s23_s10 = int_to_ptr.vmem [resolvable:$true] %s22_s10 }
   0x3   :  { %p406_p1 = scmp.lt.u32.totalorder %s402_s13, %s579_s0 }
   0x5   :  { %p408_p2 = pnand %p406_p1, %p403_p0 }
   0x7   :  { %411 = shalt.err (!%p408_p2)
}
   0x8   :  { %s412_s18 = scalar_lea.vmem %s23_s10, 128  ;;  %p417_p4 = scmp.lt.s32.totalorder %s23_s10, %s23_s10 }
   0x9   :  { %p413_p3 = scmp.ne.s32.totalorder %s23_s10, %s412_s18  ;;  %p418_p5 = scmp.lt.s32.totalorder %s412_s18, %s412_s18 }
   0xb   :  { %p419_p6 = por %p418_p5, %p417_p4 }
   0xd   :  { %p420_p7 = pnand %p419_p6, %p413_p3 }
   0xf   :  { %423 = shalt.err (!%p420_p7)
}
  0x10   :  { %25 = dma.hbm_to_vmem [thread:$0]  %s579_s0, 128, %s23_s10, [#allocation3]  }
  0x11   :  { %446 = dma.done.wait [#allocation3], 128  }
  0x12   :  { %447 = vsyncadd [#allocation3], 4294967168  ;;  %v451_v0 = vmov 0.0|0.0   ;;  %vm452_vm0 = vmmov 0   ;;  %v453_v1 = vmov 0.0   ;;  %v46_v2 = vld [vmem:[%s580_s1] sm:$0xff] }
  0x13   :  { %382 = vmatprep.subr.bf16.mxu0 %v451_v0  ;;  %357 = vmatprep.mubr.msk.f32.mxu0 %vm452_vm0, %v453_v1  ;;  %v47_v3 = vld [vmem:[%s580_s1 + $0x8] sm:$0xff]  ;;  %v130_v5 = vld [vmem:[%s582_s3] sm:$0xff]  ;;  %vm55_vm1 = vcmask 130048   ;;  %v132_v9 = vld [vmem:[%s582_s3 + $0x10] sm:$0xff]  ;;  %vm141_vm2 = vcmask 261120  }
  0x14   :  { %385 = vmatprep.subr.bf16.mxu1 %v451_v0  ;;  %368 = vmatprep.mubr.msk.f32.mxu1 %vm452_vm0, %v453_v1  ;;  %v383_v4 = vpack.c.bf16 %v47_v3, %v46_v2  ;;  %v131_v6 = vld [vmem:[%s582_s3 + $0x8] sm:$0xff]  ;;  %v45_v8 = vld [vmem:[#allocation2] sm:$0xff]  ;;  %v133_v10 = vld [vmem:[%s582_s3 + $0x18] sm:$0xff] }
  0x15   :  { %v386_v7 = vpack.c.bf16 %v131_v6, %v130_v5  ;;  %v389_v11 = vpack.c.bf16 %v133_v10, %v132_v9  ;;  %v216_v12 = vld [vmem:[%s584_s5] sm:$0xff]  ;;  %v217_v13 = vld [vmem:[%s584_s5 + $0x8] sm:$0xff]  ;;  %v218_v20 = vld [vmem:[%s584_s5 + $0x10] sm:$0xff] }
  0x16   :  { %384 = vmatpush3.bf16.msra.mxu0 %v383_v4  ;;  %v392_v14 = vpack.c.bf16 %v217_v13, %v216_v12  ;;  %v332_v15 = vld [vmem:[%s581_s2] ss:$0 sm:$0xff]  ;;  %v219_v21 = vld [vmem:[%s584_s5 + $0x18] sm:$0xff] }
  0x17   :  { %387 = vmatpush3.bf16.msra.mxu1 %v386_v7  ;;  %391 = vmatprep.subr.bf16.mxu0 %v451_v0  ;;  %v395_v22 = vpack.c.bf16 %v219_v21, %v218_v20  ;;  %v334_v23 = vld [vmem:[%s583_s4] ss:$0 sm:$0xff]  ;;  %s454_s4 = smov [#allocation5]  }
  0x18   :  { %388 = vmatprep.subr.bf16.mxu1 %v451_v0  ;;  %v336_v28 = vld [vmem:[%s585_s6] ss:$0 sm:$0xff]  ;;  %s323_s0 = sshll.u32 %s454_s4, 4  ;;  %s324_s0 = int_to_ptr.vmem [resolvable:$true] %s323_s0 }
  0x19   :  { %358 = vmatmul.mubr.msk.f32.vlgmr.msra.gmra.mrb[0].mxu0 %vm55_vm1, %v45_v8  ;;  %v338_v30 = vld [vmem:[%s586_s7] ss:$0 sm:$0xff]  ;;  %s424_s25 = scalar_lea.vmem %s324_s0, 128  ;;  %p429_p9 = scmp.lt.s32.totalorder %s324_s0, %s324_s0 }
  0x1a   :  { %379 = vmatprep.mubr.msk.f32.mxu0 %vm452_vm0, %v453_v1  ;;  %393 = vmatpush3.bf16.msra.mxu0 %v392_v14  ;;  %v339_v33 = vld [vmem:[%s587_s8] ss:$0 sm:$0xff]  ;;  %p425_p8 = scmp.ne.s32.totalorder %s324_s0, %s424_s25  ;;  %p430_p10 = scmp.lt.s32.totalorder %s424_s25, %s424_s25 }
  0x1b   :  { %390 = vmatpush3.bf16.msra.mxu1 %v389_v11  ;;  %394 = vmatprep.subr.bf16.mxu0 %v451_v0 }
  0x1c   :  { %p431_p11 = por %p430_p10, %p429_p9 }
  0x1e   :  { %396 = vmatpush3.bf16.msra.mxu0 %v395_v22  ;;  %p432_p12 = pnand %p431_p11, %p425_p8 }
  0xec   :  { %v125_v16 = vpop.f32.mrb[0].mxu0 }
  0xed   :  { %v126_v17 = vadd.f32 %v332_v15, %v125_v16  ;;  %v359_v18 = vpop.f32.mrb[1].mxu0 }
  0xef   :  { %v129_v19 = vmax.f32 %v126_v17, 0.0 }
  0xf1   :  { %369 = vmatmul.mubr.msk.f32.vlgmr.msra.gmra.mrb[0].mxu1 %vm141_vm2, %v129_v19 }
 0x1c4   :  { %v211_v24 = vpop.f32.mrb[0].mxu1 }
 0x1c5   :  { %v212_v25 = vadd.f32 %v334_v23, %v211_v24  ;;  %v370_v26 = vpop.f32.mrb[1].mxu1 }
 0x1c7   :  { %v215_v27 = vmax.f32 %v212_v25, 0.0 }
 0x1c9   :  { %380 = vmatmul.mubr.msk.f32.vlgmr.msra.gmra.mrb[2].mxu0 %vm141_vm2, %v215_v27 }
 0x29c   :  { %v296_v29 = vpop.f32.mrb[2].mxu0 }
 0x29d   :  { %v297_v31 = vadd.f32 %v336_v28, %v296_v29  ;;  %v381_v32 = vpop.f32.mrb[3].mxu0 }
 0x29f   :  { %v307_v34 = vmax.f32 %v297_v31, %v338_v30 }
 0x2a1   :  { %v315_v35 = vmin.f32 %v307_v34, %v339_v33 }
 0x2a3   :  { %316 = vst.msk [vmem:[#allocation5] sm:$0xff] %vm55_vm1, %v315_v35 }
 0x2a4   :  { %435 = shalt.err (!%p432_p12)
}
 0x2a5   :  { %s436_s26 = scalar_lea.hbm %s588_s9, 128 }
 0x2a6   :  { %p437_p13 = scmp.ne.s32.totalorder %s588_s9, %s436_s26  ;;  %p440_p0 = scmp.lt.u32.totalorder %s436_s26, %s588_s9 }
 0x2a8   :  { %p442_p1 = pnand %p440_p0, %p437_p13 }
 0x2aa   :  { %445 = shalt.err (!%p442_p1)
}
 0x2ab   :  { %326 = dma.vmem_to_hbm [thread:$0]  %s324_s0, 128, %s588_s9, [#allocation4]  }
 0x2ac   :  { %448 = dma.done.wait [#allocation4], 128  }
 0x2ad   :  { %449 = vsyncadd [#allocation4], 4294967168 }
 0x2ae   :  { %330 = vsyncpa [#allocation3], 1 }
 0x2af   :  { %331 = vsyncpa [#allocation4], 1 }

</bundles_post_ra>
